<compile_context>
chip_gen: v7x
topology: tpu7x:2x2x1
jax: 0.10.0
libtpu: 0.0.40
codegen_flags: <defaults>
</compile_context>

<pallas_src>
import jax
import jax.numpy as jnp
import numpy as np
from jax.experimental import pallas as pl
from jax.experimental.pallas import tpu as pltpu

EPS = 1e-8  # matches the PyTorch module default


def _adain_kernel(c_ref, s_ref, x_ref, out_ref):
    # Blocks are (BT, C, HW_TILE) in the input dtype; math is done in f32.
    c = c_ref[...].astype(jnp.float32)
    s = s_ref[...].astype(jnp.float32)
    x = x_ref[...].astype(jnp.float32)

    n = c.shape[1]                 # channel count (reduction length)
    inv_n = 1.0 / n
    inv_nm1 = 1.0 / (n - 1)        # torch.std is unbiased (ddof=1); C>=2 asserted

    def mean_std(t):
        # Two-pass (centered) statistics: numerically stable vs E[x^2]-E[x]^2.
        mean = jnp.sum(t, axis=1, keepdims=True) * inv_n
        d = t - mean
        var = jnp.sum(d * d, axis=1, keepdims=True) * inv_nm1
        return mean, jnp.sqrt(var)

    mean_c, std_c = mean_std(c)
    mean_s, std_s = mean_std(s)

    # eps is added to std (not var), exactly as in the PyTorch forward.
    # Hoist the divide onto the (BT,1,HW_TILE) stats and fold the affine so the
    # full-size tensor only sees one mul + one add.
    inv_c = pl.reciprocal(std_c + EPS)
    scale = std_s * inv_c
    shift = mean_s - mean_c * scale
    out_ref[...] = (x * scale + shift).astype(out_ref.dtype)


def _choose_tiling(B, C, HW, itemsize, vmem_bytes):
    """Pick (bt, hw_tile, vmem_limit_bytes) for block shape (bt, C, hw_tile)."""
    vmem_limit = int(vmem_bytes * 3 // 4)
    # 4 streams (c, s, x, out) x 2 pipeline buffers, plus headroom for the f32
    # temporaries inside the kernel -> divide the scoped limit by ~12.
    block_budget = max(vmem_limit // 12, 128 * 1024)

    c_pad = -(-C // 8) * 8                     # f32 sublane tile is 8
    bytes_per_elem = max(int(itemsize), 4)     # conservative (f32 temporaries)

    def block_bytes(bt, hwt):
        return bt * c_pad * hwt * bytes_per_elem

    # --- HW (lane) tile: multiple of 128 dividing HW, or the full HW. ---
    hw_tile = HW
    lane_divisors = [d for d in range(128, HW + 1, 128) if HW % d == 0]
    if block_bytes(1, HW) > block_budget and lane_divisors:
        fitting = [d for d in lane_divisors if block_bytes(1, d) <= block_budget]
        hw_tile = max(fitting) if fitting else min(lane_divisors)

    # --- Batch tile: largest divisor of B that keeps the block in budget. ---
    bt = 1
    max_bt = min(B, block_budget // max(block_bytes(1, hw_tile), 1))
    for cand in range(max_bt, 0, -1):
        if B % cand == 0 and block_bytes(cand, hw_tile) <= block_budget:
            bt = cand
            break

    # --- v7x megacore: make sure there are at least 2 parallel grid steps. ---
    if (B // bt) * (HW // hw_tile) < 2:
        if bt > 1:
            for cand in range(bt - 1, 0, -1):
                if B % cand == 0:
                    bt = cand
                    break
        else:
            smaller = [d for d in lane_divisors if d < HW]
            if smaller:
                hw_tile = max(smaller)

    return bt, hw_tile, vmem_limit


def adain(c, s, x):
    """c, s, x: (B, C, H, W), any float dtype. Returns AdaIn(c, s, x) in x.dtype."""
    assert c.shape == s.shape == x.shape
    B, C, H, W = x.shape
    # torch.std(dim=1, unbiased=True) on a single channel is NaN; require C >= 2.
    assert C >= 2, "AdaIn requires at least 2 channels (unbiased std over dim=1)"
    HW = H * W
    dtype = x.dtype

    # Flatten spatial dims so the lane axis (HW) is dense; C sits on sublanes.
    c2 = c.reshape(B, C, HW)
    s2 = s.reshape(B, C, HW)
    x2 = x.reshape(B, C, HW)

    try:
        vmem_bytes = int(pltpu.get_tpu_info().vmem_capacity_bytes)
    except Exception:
        vmem_bytes = 64 * 1024 * 1024  # smallest per-TC VMEM across generations

    bt, hw_tile, vmem_limit = _choose_tiling(
        B, C, HW, jnp.dtype(dtype).itemsize, vmem_bytes)

    grid = (B // bt, HW // hw_tile)
    blk = pl.BlockSpec((bt, C, hw_tile), lambda b, h: (b, 0, h))

    out = pl.pallas_call(
        _adain_kernel,
        out_shape=jax.ShapeDtypeStruct((B, C, HW), dtype),
        grid_spec=pl.GridSpec(
            grid=grid,
            in_specs=[blk, blk, blk],
            out_specs=blk,
        ),
        compiler_params=pltpu.CompilerParams(
            dimension_semantics=("parallel", "parallel"),
            vmem_limit_bytes=vmem_limit,
        ),
    )(c2, s2, x2)

    return out.reshape(B, C, H, W)


def _reference(c, s, x):
    """Pure-JAX mirror of the PyTorch forward (unbiased std, eps on std)."""
    c = c.astype(jnp.float32)
    s = s.astype(jnp.float32)
    x = x.astype(jnp.float32)
    mean_c = jnp.mean(c, axis=1, keepdims=True)
    std_c = jnp.std(c, axis=1, keepdims=True, ddof=1)
    mean_s = jnp.mean(s, axis=1, keepdims=True)
    std_s = jnp.std(s, axis=1, keepdims=True, ddof=1)
    y = (x - mean_c) / (std_c + EPS)
    return y * std_s + mean_s


if __name__ == "__main__":
    key = jax.random.PRNGKey(0)
    kc, ks, kx = jax.random.split(key, 3)

    B, C, H, W = 2, 4, 16, 16
    c = jax.random.normal(kc, (B, C, H, W), jnp.float32)
    s = jax.random.normal(ks, (B, C, H, W), jnp.float32)
    x = jax.random.normal(kx, (B, C, H, W), jnp.float32)

    out = jax.block_until_ready(adain(c, s, x))
    ref = jax.block_until_ready(_reference(c, s, x))

    np.testing.assert_allclose(np.asarray(out), np.asarray(ref),
                               rtol=1e-4, atol=1e-5)
    print("KERNEL_OK")
</pallas_src>

<mosaic_0001>
module attributes {stable_mosaic.version = 11 : i64} {
  func.func @_adain_kernel(%arg0: i32, %arg1: i32, %arg2: memref<1x4x256xf32, #tpu.memory_space<vmem>>, %arg3: memref<1x4x256xf32, #tpu.memory_space<vmem>>, %arg4: memref<1x4x256xf32, #tpu.memory_space<vmem>>, %arg5: memref<1x4x256xf32, #tpu.memory_space<vmem>>) attributes {dimension_semantics = [#tpu.dimension_semantics<parallel>, #tpu.dimension_semantics<parallel>], iteration_bounds = array<i64: 2, 1>, scalar_prefetch = 0 : i64, scratch_operands = 0 : i64, tpu.core_type = #tpu.core_type<tc>, window_params = [{transform_indices = @transform_0, window_bounds = array<i64: 1, 4, 256>}, {transform_indices = @transform_1, window_bounds = array<i64: 1, 4, 256>}, {transform_indices = @transform_2, window_bounds = array<i64: 1, 4, 256>}, {transform_indices = @transform_3, window_bounds = array<i64: 1, 4, 256>}]} {
    %c0 = arith.constant 0 : index
    %c0_0 = arith.constant 0 : index
    %c0_1 = arith.constant 0 : index
    %0 = vector.load %arg2[%c0, %c0_0, %c0_1] : memref<1x4x256xf32, #tpu.memory_space<vmem>>, vector<1x4x256xf32>
    %c0_2 = arith.constant 0 : index
    %c0_3 = arith.constant 0 : index
    %c0_4 = arith.constant 0 : index
    %1 = vector.load %arg3[%c0_2, %c0_3, %c0_4] : memref<1x4x256xf32, #tpu.memory_space<vmem>>, vector<1x4x256xf32>
    %c0_5 = arith.constant 0 : index
    %c0_6 = arith.constant 0 : index
    %c0_7 = arith.constant 0 : index
    %2 = vector.load %arg4[%c0_5, %c0_6, %c0_7] : memref<1x4x256xf32, #tpu.memory_space<vmem>>, vector<1x4x256xf32>
    %cst = arith.constant dense<0.000000e+00> : vector<1x256xf32>
    %3 = vector.multi_reduction <add>, %0, %cst [1] : vector<1x4x256xf32> to vector<1x256xf32>
    %4 = vector.shape_cast %3 : vector<1x256xf32> to vector<1x1x256xf32>
    %cst_8 = arith.constant 2.500000e-01 : f32
    %5 = vector.broadcast %cst_8 : f32 to vector<1x1x256xf32>
    %6 = arith.mulf %4, %5 : vector<1x1x256xf32>
    %7 = vector.broadcast %6 : vector<1x1x256xf32> to vector<1x4x256xf32>
    %8 = arith.subf %0, %7 : vector<1x4x256xf32>
    %9 = arith.mulf %8, %8 : vector<1x4x256xf32>
    %cst_9 = arith.constant dense<0.000000e+00> : vector<1x256xf32>
    %10 = vector.multi_reduction <add>, %9, %cst_9 [1] : vector<1x4x256xf32> to vector<1x256xf32>
    %11 = vector.shape_cast %10 : vector<1x256xf32> to vector<1x1x256xf32>
    %cst_10 = arith.constant 0.333333343 : f32
    %12 = vector.broadcast %cst_10 : f32 to vector<1x1x256xf32>
    %13 = arith.mulf %11, %12 : vector<1x1x256xf32>
    %14 = math.sqrt %13 : vector<1x1x256xf32>
    %cst_11 = arith.constant dense<0.000000e+00> : vector<1x256xf32>
    %15 = vector.multi_reduction <add>, %1, %cst_11 [1] : vector<1x4x256xf32> to vector<1x256xf32>
    %16 = vector.shape_cast %15 : vector<1x256xf32> to vector<1x1x256xf32>
    %cst_12 = arith.constant 2.500000e-01 : f32
    %17 = vector.broadcast %cst_12 : f32 to vector<1x1x256xf32>
    %18 = arith.mulf %16, %17 : vector<1x1x256xf32>
    %19 = vector.broadcast %18 : vector<1x1x256xf32> to vector<1x4x256xf32>
    %20 = arith.subf %1, %19 : vector<1x4x256xf32>
    %21 = arith.mulf %20, %20 : vector<1x4x256xf32>
    %cst_13 = arith.constant dense<0.000000e+00> : vector<1x256xf32>
    %22 = vector.multi_reduction <add>, %21, %cst_13 [1] : vector<1x4x256xf32> to vector<1x256xf32>
    %23 = vector.shape_cast %22 : vector<1x256xf32> to vector<1x1x256xf32>
    %cst_14 = arith.constant 0.333333343 : f32
    %24 = vector.broadcast %cst_14 : f32 to vector<1x1x256xf32>
    %25 = arith.mulf %23, %24 : vector<1x1x256xf32>
    %26 = math.sqrt %25 : vector<1x1x256xf32>
    %cst_15 = arith.constant 9.99999993E-9 : f32
    %27 = vector.broadcast %cst_15 : f32 to vector<1x1x256xf32>
    %28 = arith.addf %14, %27 : vector<1x1x256xf32>
    %29 = tpu.reciprocal %28 : vector<1x1x256xf32> -> vector<1x1x256xf32>
    %30 = arith.mulf %26, %29 : vector<1x1x256xf32>
    %31 = arith.mulf %6, %30 : vector<1x1x256xf32>
    %32 = arith.subf %18, %31 : vector<1x1x256xf32>
    %33 = vector.broadcast %30 : vector<1x1x256xf32> to vector<1x4x256xf32>
    %34 = arith.mulf %2, %33 : vector<1x4x256xf32>
    %35 = vector.broadcast %32 : vector<1x1x256xf32> to vector<1x4x256xf32>
    %36 = arith.addf %34, %35 : vector<1x4x256xf32>
    %c0_16 = arith.constant 0 : index
    %c0_17 = arith.constant 0 : index
    %c0_18 = arith.constant 0 : index
    %37 = vector.load %arg5[%c0_16, %c0_17, %c0_18] : memref<1x4x256xf32, #tpu.memory_space<vmem>>, vector<1x4x256xf32>
    tpu.vector_store %arg5[%c0_16, %c0_17, %c0_18], %36 {strides = array<i32>} : memref<1x4x256xf32, #tpu.memory_space<vmem>>, vector<1x4x256xf32>,
    return
  }
  func.func @transform_0(%arg0: i32, %arg1: i32) -> (i32, i32, i32) {
    %c0_i32 = arith.constant 0 : i32
    %c0_i32_0 = arith.constant 0 : i32
    return %arg0, %c0_i32, %arg1 : i32, i32, i32
  }
  func.func @transform_1(%arg0: i32, %arg1: i32) -> (i32, i32, i32) {
    %c0_i32 = arith.constant 0 : i32
    %c0_i32_0 = arith.constant 0 : i32
    return %arg0, %c0_i32, %arg1 : i32, i32, i32
  }
  func.func @transform_2(%arg0: i32, %arg1: i32) -> (i32, i32, i32) {
    %c0_i32 = arith.constant 0 : i32
    %c0_i32_0 = arith.constant 0 : i32
    return %arg0, %c0_i32, %arg1 : i32, i32, i32
  }
  func.func @transform_3(%arg0: i32, %arg1: i32) -> (i32, i32, i32) {
    %c0_i32 = arith.constant 0 : i32
    %c0_i32_0 = arith.constant 0 : i32
    return %arg0, %c0_i32, %arg1 : i32, i32, i32
  }
}

</mosaic_0001>

<bundles_post_ra>
// kernel: tpu_custom_call.1
= control target key start
LH: loop header
LB: loop body
LE: loop exit
PB: predicated region body
PF: predicated region fallthrough
CT: control target
= control target key end

     0   :  { %s1184_s0 = inlined_call_operand.hbm [shape: f32[2,4,256], index: 0, kind: input, shape index: {}]   ;;  %s1185_s1 = inlined_call_operand.hbm [shape: f32[2,4,256], index: 1, kind: input, shape index: {}]   ;;  %s1186_s2 = inlined_call_operand.hbm [shape: f32[2,4,256], index: 2, kind: input, shape index: {}]   ;;  %s1187_s3 = inlined_call_operand.hbm [shape: f32[2,4,256], index: 3, kind: output, shape index: {}]  }
   0x1   :  { %1193 = sst [smem:[#allocation15_spill]] %s1185_s1 }
   0x2   :  { %8 = vsyncpa [#allocation3], 0 }
   0x3   :  { %10 = vsyncpa [#allocation3 + $0x1], 0 }
   0x4   :  { %11 = vsyncpa [#allocation6], 0 }
   0x5   :  { %13 = vsyncpa [#allocation6 + $0x1], 0 }
   0x6   :  { %14 = vsyncpa [#allocation4], 0 }
   0x7   :  { %16 = vsyncpa [#allocation4 + $0x1], 0  ;;  %s896_s12 = smov 0   ;;  %s898_s13 = smov 0  }
   0x8   :  { %s900_s14 = smov 0   ;;  %s902_s15 = smov 0  }
   0x9   :  { %s904_s16 = smov 0   ;;  %s906_s17 = smov 0  }
   0xa LB: > { %1194 = sst [smem:[#allocation12_spill]] %s866_s16  ;;  %s927_s18 = sadd.s32 4294967295, %s870_s17   ;;  %s870_s17 = sphi %s906_s17, %s22_s17   ;;  %s866_s16 = sphi %s904_s16, %s1215_s16   ;;  %s862_s15 = sphi %s902_s15, %s1214_s15   ;;  %s858_s14 = sphi %s900_s14, %s1218_s14   ;;  %s854_s13 = sphi %s898_s13, %s1217_s13   ;;  %s850_s12 = sphi %s896_s12, %s1216_s12  }
   0xb   : > { %s582_s19 = sadd.s32 4294967294, %s870_s17   ;;  %s34_s20 = sadd.s32 1, %s866_s16 }
   0xc   : > { %s43_s21 = sadd.s32 1, %s858_s14  ;;  %p36_p0 = scmp.ge.s32.totalorder %s34_s20, 2 }
   0xd   : > { %p50_p1 = scmp.ne.s32.totalorder %s858_s14, %s854_s13  ;;  %p51_p2 = scmp.eq.s32.totalorder %s870_s17, 0 }
   0xe   : > { %p56_p3 = scmp.ne.s32.totalorder %s854_s13, %s850_s12  ;;  %s1220_s20 = smov (%p36_p0, %s34_s20), 0 }
   0xf   : > { %1195 = sst [smem:[#allocation13_spill]] %s1220_s20  ;;  %p939_p4 = por %p51_p2, %p50_p1 }
  0x10   : > { %p57_p5 = scmp.eq.s32.totalorder %s927_s18, 0  ;;  %s38_s23 = ssub.s32 %s866_s16, %s1220_s20 }
  0x11   : > { %p138_p6 = scmp.eq.s32.totalorder %s927_s18, 1  ;;  %p41_p7 = scmp.eq.s32.totalorder %s38_s23, 0 }
  0x12   : > { %p947_p8 = por %p57_p5, %p56_p3  ;;  %p144_p10 = scmp.eq.s32.totalorder %s582_s19, 1 }
  0x13   : > { %p951_p9 = por %p138_p6, %p50_p1  ;;  %p630_p13 = scmp.lt.s32.totalorder %s870_s17, 2 }
  0x14   : > { %s1197_s24 = scalar_select %p947_p8, 1, 0 }
  0x15   : > { %s1198_s25 = scalar_select %p951_p9, 1, 0 }
  0x16   : > { %s956_s26 = scalar_select %p41_p7, %s858_s14, %s43_s21  }
  0x17   : > { %p958_p11 = por %p144_p10, %p56_p3  ;;  %s164_s28 = sand.u32 1, %s858_s14  }
  0x18   : > { %1199 = sst [smem:[#allocation14_spill]] %s956_s26  ;;  %s967_s29 = sshll.u32 %s164_s28, 3 }
  0x19   : > { %s1200_s27 = scalar_select %p958_p11, 1, 0 }
  0x1a   : > { %s970_s30 = sshll.u32 %s866_s16, 7  ;;  %p974_p0 = pnand %p630_p13, %p939_p4 }
  0x1b   : > { %s185_s5 = sand.u32 1, %s870_s17   ;;  %s1202_s1 = sld [smem:[#allocation15_spill]] }
  0x1c   : > { %s1201_s4 = scalar_select %p974_p0, 1, 0 }
  0x1d   : > { %s189_s9 = scalar_lea.vmem [#allocation5], %s967_s29  ;;  %s990_s11 = scalar_lea.sflag [#allocation6], %s185_s5 }
  0x1e   : > { %s199_s10 = sshll.u32 %s189_s9, 4  ;;  %p996_p4 = pneg %p974_p0  ;;  %s987_s10 = int_to_ptr.vmem [resolvable:$true] %s199_s10 }
  0x21   : > { %s983_s8 = scalar_lea.hbm %s1202_s1, %s970_s30  ;;  %s699_s6 = scalar_lea.hbm %s1202_s1, 256 }
  0x22   : > { %s694_s19 = scalar_lea.hbm %s983_s8, 128  ;;  %p700_p7 = scmp.lt.u32.totalorder %s983_s8, %s1202_s1 }
  0x23   : > { %p695_p3 = scmp.ne.s32.totalorder %s983_s8, %s694_s19  ;;  %p701_p10 = scmp.lt.u32.totalorder %s699_s6, %s694_s19 }
  0x24   : > { %p703_p12 = scmp.lt.u32.totalorder %s694_s19, %s983_s8 }
  0x25   : > { %p697_p5 = pnand %p996_p4, %p695_p3  ;;  %p702_p13 = por %p701_p10, %p700_p7 }
  0x27   : > { %p698_p6 = pneg %p697_p5  ;;  %p704_p1 = por %p703_p12, %p702_p13 }
  0x29   : > { %p705_p2 = pnand %p704_p1, %p698_p6 }
  0x2b   : > { %708 = shalt.err (!%p705_p2)
}
  0x2c   : > { %s709_s5 = scalar_lea.vmem %s987_s10, 128  ;;  %s872_s22 = smov [#allocation5]  }
  0x2d   : > { %p710_p3 = scmp.ne.s32.totalorder %s987_s10, %s709_s5  ;;  %s714_s23 = sshll.u32 %s872_s22, 4  ;;  %s715_s23 = int_to_ptr.vmem [resolvable:$false] %s714_s23 }
  0x2e   : > { %s716_s7 = scalar_lea.vmem %s715_s23, 256  ;;  %p717_p9 = scmp.lt.s32.totalorder %s987_s10, %s715_s23 }
  0x2f   : > { %p712_p5 = pnand %p710_p3, %p996_p4  ;;  %p718_p8 = scmp.lt.s32.totalorder %s716_s7, %s709_s5 }
  0x31   : > { %p713_p11 = pneg %p712_p5  ;;  %p719_p7 = por %p718_p8, %p717_p9 }
  0x33   : > { %p720_p10 = pnand %p719_p7, %p713_p11 }
  0x35   : > { %723 = shalt.err (!%p720_p10)
}
  0x36   : > { %622 = dma.hbm_to_vmem [thread:$0]  (!%p974_p0), %s983_s8, 128, %s987_s10, %s990_s11  }
  0x37   : > { %p1204_p12 = scmp.lt.s32.totalorder %s870_s17, 3  ;;  %p1205_p1 = scmp.ge.s32.totalorder %s870_s17, 1 }
  0x38   : > { %s1032_s5 = scalar_lea.hbm %s1184_s0, %s970_s30  ;;  %s168_s22 = scalar_lea.vmem [#allocation2], %s967_s29 }
  0x39   : > { %p1024_p2 = pnand %p1205_p1, %p1204_p12  ;;  %s178_s23 = sshll.u32 %s168_s22, 4  ;;  %s1035_s23 = int_to_ptr.vmem [resolvable:$true] %s178_s23 }
  0x3a   : > { %s1041_s7 = scalar_lea.hbm %s1186_s2, %s970_s30  ;;  %s165_s1 = scalar_lea.sflag [#allocation3], %s164_s28 }
  0x3b   : > { %s1206_s19 = scalar_select %p1024_p2, 1, 0 }
  0x3c   : > { %s724_s20 = scalar_lea.hbm %s1032_s5, 128  ;;  %s729_s16 = scalar_lea.hbm %s1184_s0, 256 }
  0x3d   : > { %p725_p8 = scmp.ne.s32.totalorder %s1032_s5, %s724_s20  ;;  %p730_p6 = scmp.lt.u32.totalorder %s1032_s5, %s1184_s0 }
  0x3e   : > { %p731_p13 = scmp.lt.u32.totalorder %s729_s16, %s724_s20  ;;  %p733_p5 = scmp.lt.u32.totalorder %s724_s20, %s1032_s5 }
  0x3f   : > { %p727_p9 = pnand %p725_p8, %p996_p4 }
  0x40   : > { %p732_p3 = por %p731_p13, %p730_p6 }
  0x41   : > { %p728_p11 = pneg %p727_p9 }
  0x42   : > { %p734_p7 = por %p733_p5, %p732_p3 }
  0x44   : > { %p735_p10 = pnand %p734_p7, %p728_p11 }
  0x46   : > { %738 = shalt.err (!%p735_p10)
}
  0x47   : > { %s739_s28 = scalar_lea.vmem %s1035_s23, 128  ;;  %s873_s30 = smov [#allocation2]  }
  0x48   : > { %p740_p12 = scmp.ne.s32.totalorder %s1035_s23, %s739_s28  ;;  %s744_s8 = sshll.u32 %s873_s30, 4  ;;  %s745_s8 = int_to_ptr.vmem [resolvable:$false] %s744_s8 }
  0x49   : > { %s746_s26 = scalar_lea.vmem %s745_s8, 256  ;;  %p747_p9 = scmp.lt.s32.totalorder %s1035_s23, %s745_s8 }
  0x4a   : > { %p742_p1 = pnand %p740_p12, %p996_p4  ;;  %p748_p2 = scmp.lt.s32.totalorder %s746_s26, %s739_s28 }
  0x4c   : > { %p743_p8 = pneg %p742_p1  ;;  %p749_p6 = por %p748_p2, %p747_p9 }
  0x4e   : > { %p750_p13 = pnand %p749_p6, %p743_p8 }
  0x50   : > { %753 = shalt.err (!%p750_p13)
}
  0x51   : > { %619 = dma.hbm_to_vmem [thread:$0]  (!%p974_p0), %s1032_s5, 128, %s1035_s23, %s165_s1  }
  0x52   : > { %s210_s16 = scalar_lea.vmem [#allocation7], %s967_s29  ;;  %s754_s10 = scalar_lea.hbm %s1041_s7, 128 }
  0x53   : > { %s220_s20 = sshll.u32 %s210_s16, 4  ;;  %p755_p11 = scmp.ne.s32.totalorder %s1041_s7, %s754_s10  ;;  %s221_s20 = int_to_ptr.vmem [resolvable:$true] %s220_s20 }
  0x54   : > { %s759_s22 = scalar_lea.hbm %s1186_s2, 256  ;;  %p760_p5 = scmp.lt.u32.totalorder %s1041_s7, %s1186_s2 }
  0x55   : > { %p757_p2 = pnand %p755_p11, %p996_p4  ;;  %p761_p7 = scmp.lt.u32.totalorder %s759_s22, %s754_s10 }
  0x56   : > { %p763_p12 = scmp.lt.u32.totalorder %s754_s10, %s1041_s7 }
  0x57   : > { %p758_p3 = pneg %p757_p2  ;;  %p762_p10 = por %p761_p7, %p760_p5 }
  0x59   : > { %p764_p1 = por %p763_p12, %p762_p10 }
  0x5b   : > { %p765_p8 = pnand %p764_p1, %p758_p3 }
  0x5d   : > { %768 = shalt.err (!%p765_p8)
}
  0x5e   : > { %s769_s1 = scalar_lea.vmem %s221_s20, 128  ;;  %s874_s29 = smov [#allocation7]  }
  0x5f   : > { %p770_p9 = scmp.ne.s32.totalorder %s221_s20, %s769_s1  ;;  %s774_s5 = sshll.u32 %s874_s29, 4  ;;  %s775_s5 = int_to_ptr.vmem [resolvable:$false] %s774_s5 }
  0x60   : > { %s776_s23 = scalar_lea.vmem %s775_s5, 256  ;;  %p777_p11 = scmp.lt.s32.totalorder %s221_s20, %s775_s5 }
  0x61   : > { %p772_p6 = pnand %p770_p9, %p996_p4  ;;  %p778_p2 = scmp.lt.s32.totalorder %s776_s23, %s769_s1 }
  0x63   : > { %p773_p13 = pneg %p772_p6  ;;  %p779_p0 = por %p778_p2, %p777_p11 }
  0x65   : > { %p780_p5 = pnand %p779_p0, %p773_p13 }
  0x67   : > { %783 = shalt.err (!%p780_p5)
}
  0x68   : > { %p1207_p7 = scmp.ne.s32.totalorder %s1201_s4, 0  ;;  %p1208_p3 = scmp.ne.s32.totalorder %s1206_s19, 0 }
  0x69   : > { %s1088_s21 = sand.u32 (!%p1208_p3), 1, %s854_s13   ;;  %p1209_p0 = scmp.ne.s32.totalorder (!%p1208_p3), %s1197_s24, 0 }
  0x6a   : > { %625 = dma.hbm_to_vmem [thread:$0]  (!%p1207_p7), %s1041_s7, 128, %s221_s20, %s990_s11  }
  0x6b   : > { %229 = sbr.rel (%p1208_p3) target bundleno = 211 (0xd3), region = 32  ;;  %s1091_s8 = sshll.u32 (!%p1208_p3), %s1088_s21, 3 }
  0x6c   : > { %s232_s26 = scalar_lea.sflag (!%p1208_p3), [#allocation3], %s1088_s21  ;;  %s235_s16 = scalar_lea.vmem (!%p1208_p3), [#allocation2], %s1091_s8 }
  0x72   : > { %837 = dma.done.wait (%p1209_p0), %s232_s26, 128  }
  0x73   : > { %839 = vsyncadd (%p1209_p0), %s232_s26, 4294967168  ;;  %s240_s4 = sand.u32 1, %s927_s18   ;;  %s244_s19 = scalar_lea.vmem [#allocation5], %s1091_s8 }
  0x74   : > { %s241_s11 = scalar_lea.sflag [#allocation6], %s240_s4 }
  0x75   : > { %841 = dma.done.wait (%p1209_p0), %s241_s11, 256  }
  0x76   : > { %843 = vsyncadd (%p1209_p0), %s241_s11, 4294967040  ;;  %vm296_vm0 = vcmask 1043456   ;;  %v290_v0 = vld [vmem:[%s235_s16] sm:$0xff]  ;;  %v291_v1 = vld [vmem:[%s244_s19] sm:$0xff]  ;;  %s253_s18 = scalar_lea.vmem [#allocation7], %s1091_s8  ;;  %s285_s24 = scalar_lea.vmem [#allocation8], %s1091_s8 }
  0x77   : > { %v294_v2 = vcombine.high %v290_v0, %v290_v0  ;;  %v297_v3 = vsel %vm296_vm0, %v290_v0, 0.0  ;;  %v353_v4 = vcombine.high %v291_v1, %v291_v1  ;;  %v355_v5 = vsel %vm296_vm0, %v291_v1, 0.0  ;;  %s448_s7 = sshll.u32 %s285_s24, 4  ;;  %s607_s20 = sshll.u32 %s862_s15, 7  ;;  %s1132_s7 = int_to_ptr.vmem [resolvable:$true] %s448_s7 }
  0x78   : > { %v298_v6 = vrot.slane %v297_v3, 4  ;;  %v356_v7 = vrot.slane %v355_v5, 4  ;;  %s1137_s9 = scalar_lea.hbm %s1187_s3, %s607_s20  ;;  %s432_s22 = scalar_lea.sflag [#allocation4], %s1088_s21 }
  0x79   : > { %v304_v8 = vsel %vm296_vm0, %v294_v2, 0.0  ;;  %v362_v9 = vsel %vm296_vm0, %v353_v4, 0.0  ;;  %s784_s28 = scalar_lea.vmem %s1132_s7, 128  ;;  %p1210_p10 = scmp.ne.s32.totalorder %s1198_s25, 0 }
  0x7a   : > { %v299_v10 = vadd.f32 %v298_v6, %v297_v3  ;;  %v305_v11 = vrot.slane %v304_v8, 4  ;;  %v357_v12 = vadd.f32 %v356_v7, %v355_v5  ;;  %v363_v13 = vrot.slane %v362_v9, 4  ;;  %p785_p4 = scmp.ne.s32.totalorder %s1132_s7, %s784_s28  ;;  %s875_s15 = smov [#allocation8]  }
  0x7b   : > { %s788_s30 = sshll.u32 %s875_s15, 4  ;;  %s789_s30 = int_to_ptr.vmem [resolvable:$false] %s788_s30 }
  0x7c   : > { %v300_v14 = vrot.slane %v299_v10, 2  ;;  %v306_v15 = vadd.f32 %v305_v11, %v304_v8  ;;  %v358_v16 = vrot.slane %v357_v12, 2  ;;  %v364_v17 = vadd.f32 %v363_v13, %v362_v9  ;;  %p786_p12 = pnand %p785_p4, %p1210_p10  ;;  %s790_s1 = scalar_lea.vmem %s789_s30, 256 }
  0x7d   : > { %p791_p8 = scmp.lt.s32.totalorder %s1132_s7, %s789_s30  ;;  %p792_p9 = scmp.lt.s32.totalorder %s790_s1, %s784_s28 }
  0x7e   : > { %v301_v18 = vadd.f32 %v300_v14, %v299_v10  ;;  %v307_v19 = vrot.slane %v306_v15, 2  ;;  %v359_v20 = vadd.f32 %v358_v16, %v357_v12  ;;  %v365_v21 = vrot.slane %v364_v17, 2  ;;  %p787_p1 = pneg %p786_p12 }
  0x7f   : > { %p793_p6 = por %p792_p9, %p791_p8 }
  0x80   : > { %v302_v22 = vrot.slane %v301_v18, 1  ;;  %v308_v23 = vadd.f32 %v307_v19, %v306_v15  ;;  %v360_v24 = vrot.slane %v359_v20, 1  ;;  %v366_v25 = vadd.f32 %v365_v21, %v364_v17 }
  0x81   : > { %p794_p13 = pnand %p793_p6, %p787_p1 }
  0x82   : > { %v303_v26 = vadd.f32 %v302_v22, %v301_v18  ;;  %v309_v27 = vrot.slane %v308_v23, 1  ;;  %v361_v28 = vadd.f32 %v360_v24, %v359_v20  ;;  %v367_v29 = vrot.slane %v366_v25, 1 }
  0x84   : > { %v310_v30 = vadd.f32 %v309_v27, %v308_v23  ;;  %v1109_v31 = vmul.f32 0.25, %v303_v26  ;;  %v368_v32 = vadd.f32 %v367_v29, %v366_v25  ;;  %v1111_v33 = vmul.f32 0.25, %v361_v28 }
  0x86   : > { %v1113_v34 = vmul.f32 0.25, %v310_v30  ;;  %v1115_v35 = vmul.f32 0.25, %v368_v32 }
  0x88   : > { %v315_v36 = vcombine.low %v1109_v31, %v1113_v34  ;;  %v373_v37 = vcombine.low %v1111_v33, %v1115_v35 }
  0x8a   : > { %v317_v38 = vsub.f32 %v290_v0, %v315_v36  ;;  %v375_v39 = vsub.f32 %v291_v1, %v373_v37 }
  0x8c   : > { %v318_v40 = vmul.f32 %v317_v38, %v317_v38  ;;  %v376_v41 = vmul.f32 %v375_v39, %v375_v39 }
  0x8e   : > { %v320_v42 = vcombine.high %v318_v40, %v318_v40  ;;  %v322_v43 = vsel %vm296_vm0, %v318_v40, 0.0  ;;  %v378_v44 = vcombine.high %v376_v41, %v376_v41  ;;  %v380_v45 = vsel %vm296_vm0, %v376_v41, 0.0 }
  0x8f   : > { %v323_v46 = vrot.slane %v322_v43, 4  ;;  %v381_v47 = vrot.slane %v380_v45, 4 }
  0x90   : > { %v329_v48 = vsel %vm296_vm0, %v320_v42, 0.0  ;;  %v387_v49 = vsel %vm296_vm0, %v378_v44, 0.0 }
  0x91   : > { %v324_v50 = vadd.f32 %v323_v46, %v322_v43  ;;  %v330_v51 = vrot.slane %v329_v48, 4  ;;  %v382_v52 = vadd.f32 %v381_v47, %v380_v45  ;;  %v388_v53 = vrot.slane %v387_v49, 4  ;;  %v292_v43 = vld [vmem:[%s253_s18] sm:$0xff] }
  0x93   : > { %v325_v54 = vrot.slane %v324_v50, 2  ;;  %v331_v55 = vadd.f32 %v330_v51, %v329_v48  ;;  %v383_v56 = vrot.slane %v382_v52, 2  ;;  %v389_v57 = vadd.f32 %v388_v53, %v387_v49 }
  0x95   : > { %v326_v58 = vadd.f32 %v325_v54, %v324_v50  ;;  %v332_v59 = vrot.slane %v331_v55, 2  ;;  %v384_v60 = vadd.f32 %v383_v56, %v382_v52  ;;  %v390_v61 = vrot.slane %v389_v57, 2 }
  0x97   : > { %v327_v62 = vrot.slane %v326_v58, 1  ;;  %v333_v63 = vadd.f32 %v332_v59, %v331_v55  ;;  %v385_v0 = vrot.slane %v384_v60, 1  ;;  %v391_v1 = vadd.f32 %v390_v61, %v389_v57 }
  0x99   : > { %v328_v2 = vadd.f32 %v327_v62, %v326_v58  ;;  %v334_v3 = vrot.slane %v333_v63, 1  ;;  %v392_v4 = vrot.slane %v391_v1, 1  ;;  %v386_v5 = vadd.f32 %v385_v0, %v384_v60 }
  0x9b   : > { %v335_v6 = vadd.f32 %v334_v3, %v333_v63  ;;  %v336_v7 = vmul.f32 0.33333334, %v328_v2  ;;  %v393_v8 = vadd.f32 %v392_v4, %v391_v1  ;;  %v394_v10 = vmul.f32 0.33333334, %v386_v5 }
  0x9d   : > { %v337_v9 = vmul.f32 0.33333334, %v335_v6  ;;  %682 = vrsqrt.f32 %v336_v7  ;;  %v395_v11 = vmul.f32 0.33333334, %v393_v8  ;;  %vm340_vm1 = vcmp.eq.f32.partialorder %v336_v7, inf }
  0x9e   : > { %v343_v13 = vand.u32 2147483648, %v336_v7  ;;  %vm342_vm2 = vcmp.eq.f32.partialorder %v336_v7, 0.0  ;;  %vm398_vm5 = vcmp.eq.f32.partialorder %v394_v10, inf  ;;  %v401_v28 = vand.u32 2147483648, %v394_v10 }
  0x9f   : > { %684 = vrsqrt.f32 %v337_v9  ;;  %vm347_vm3 = vcmp.eq.f32.partialorder %v337_v9, inf  ;;  %v350_v16 = vand.u32 2147483648, %v337_v9  ;;  %vm349_vm4 = vcmp.eq.f32.partialorder %v337_v9, 0.0 }
  0xa0   : > { %686 = vrsqrt.f32 %v394_v10  ;;  %vm405_vm6 = vcmp.eq.f32.partialorder %v395_v11, inf  ;;  %vm400_vm7 = vcmp.eq.f32.partialorder %v394_v10, 0.0  ;;  %v408_v30 = vand.u32 2147483648, %v395_v11 }
  0xa1   : > { %688 = vrsqrt.f32 %v395_v11  ;;  %vm407_vm8 = vcmp.eq.f32.partialorder %v395_v11, 0.0 }
  0xa7   : > { %v683_v12 = vpop.eup %682 }
  0xa8   : > { %v339_v14 = vmul.f32 %v683_v12, %v336_v7 }
  0xa9   : > { %v685_v15 = vpop.eup %684 }
  0xaa   : > { %v341_v17 = vsel %vm340_vm1, %v336_v7, %v339_v14  ;;  %v346_v18 = vmul.f32 %v685_v15, %v337_v9  ;;  %v687_v20 = vpop.eup %686 }
  0xab   : > { %v344_v19 = vsel %vm342_vm2, %v343_v13, %v341_v17  ;;  %v689_v24 = vpop.eup %688  ;;  %v397_v26 = vmul.f32 %v687_v20, %v394_v10 }
  0xac   : > { %v348_v21 = vsel %vm347_vm3, %v337_v9, %v346_v18  ;;  %v410_v22 = vadd.f32 1e-08, %v344_v19  ;;  %v404_v27 = vmul.f32 %v689_v24, %v395_v11 }
  0xad   : > { %v351_v23 = vsel %vm349_vm4, %v350_v16, %v348_v21  ;;  %v399_v29 = vsel %vm398_vm5, %v394_v10, %v397_v26 }
  0xae   : > { %v411_v25 = vadd.f32 1e-08, %v351_v23  ;;  %690 = vrcp.f32 %v410_v22  ;;  %v406_v32 = vsel %vm405_vm6, %v395_v11, %v404_v27  ;;  %v402_v36 = vsel %vm400_vm7, %v401_v28, %v399_v29 }
  0xaf   : > { %v409_v38 = vsel %vm407_vm8, %v408_v30, %v406_v32 }
  0xb0   : > { %692 = vrcp.f32 %v411_v25 }
  0xb8   : > { %v691_v37 = vpop.eup %690 }
  0xb9   : > { %v414_v39 = vmul.f32 %v691_v37, %v402_v36 }
  0xba   : > { %v693_v40 = vpop.eup %692 }
  0xbb   : > { %v415_v41 = vmul.f32 %v693_v40, %v409_v38  ;;  %v416_v42 = vmul.f32 %v414_v39, %v1109_v31 }
  0xbd   : > { %v417_v44 = vmul.f32 %v415_v41, %v1113_v34  ;;  %v418_v45 = vsub.f32 %v1111_v33, %v416_v42  ;;  %v422_v46 = vcombine.low %v414_v39, %v415_v41 }
  0xbf   : > { %v419_v47 = vsub.f32 %v1115_v35, %v417_v44  ;;  %v424_v48 = vmul.f32 %v422_v46, %v292_v43 }
  0xc1   : > { %v427_v49 = vcombine.low %v418_v45, %v419_v47 }
  0xc3   : > { %v429_v50 = vadd.f32 %v427_v49, %v424_v48 }
  0xc5   : > { %430 = vst [vmem:[%s285_s24] sm:$0xff] %v429_v50 }
  0xc6   : > { %797 = shalt.err (!%p794_p13)
}
  0xc7   : > { %s798_s29 = scalar_lea.hbm %s1137_s9, 128  ;;  %s802_s21 = scalar_lea.hbm %s1187_s3, 256 }
  0xc8   : > { %p799_p11 = scmp.ne.s32.totalorder %s1137_s9, %s798_s29  ;;  %p803_p7 = scmp.lt.u32.totalorder %s1137_s9, %s1187_s3 }
  0xc9   : > { %p804_p3 = scmp.lt.u32.totalorder %s802_s21, %s798_s29  ;;  %p806_p4 = scmp.lt.u32.totalorder %s798_s29, %s1137_s9 }
  0xca   : > { %p800_p2 = pnand %p799_p11, %p1210_p10 }
  0xcb   : > { %p805_p0 = por %p804_p3, %p803_p7 }
  0xcc   : > { %p801_p5 = pneg %p800_p2 }
  0xcd   : > { %p807_p12 = por %p806_p4, %p805_p0 }
  0xcf   : > { %p808_p1 = pnand %p807_p12, %p801_p5 }
  0xd1   : > { %811 = shalt.err (!%p808_p1)
}
  0xd2   : > { %614 = dma.vmem_to_hbm [thread:$0]  (%p1210_p10), %s1132_s7, 128, %s1137_s9, %s432_s22  }
  0xd3 PF: > { %s460_s16 = sand.u32 1, %s850_s12   ;;  %p1211_p8 = scmp.ne.s32.totalorder %s1200_s27, 0 }
  0xd4   : > { %p1212_p9 = scmp.ge.s32.totalorder %s870_s17, 2  ;;  %s461_s4 = scalar_lea.sflag [#allocation4], %s460_s16 }
  0xd6   : > { %p627_p6 = pnand %p1212_p9, %p1211_p8 }
  0xd8   : > { %845 = dma.done.wait (!%p627_p6), %s461_s4, 128  }
  0xd9   : > { %847 = vsyncadd (!%p627_p6), %s461_s4, 4294967168  ;;  %s22_s17 = sadd.s32 1, %s870_s17   ;;  %s1213_s25 = sld [smem:[#allocation14_spill]] }
  0xda   : > { %p19_p13 = scmp.ge.s32.totalorder %s22_s17, 4   ;;  %s1214_s15 = sld [smem:[#allocation12_spill]] }
  0xdb   : > { %s1215_s16 = sld [smem:[#allocation13_spill]]  ;;  %s1216_s12 = smov %s854_s13 }
  0xdc   : > { %s1217_s13 = smov %s858_s14  ;;  %21 = sbr.rel (!%p19_p13) target bundleno = 10 (0xa), region = 101 }
  0xdf   : > { %s1218_s14 = smov %s1213_s25 }
  0xe3   :  { %466 = vsyncpa [#allocation3], 1 }
  0xe4   :  { %468 = vsyncpa [#allocation3 + $0x1], 1 }
  0xe5   :  { %469 = vsyncpa [#allocation6], 1 }
  0xe6   :  { %471 = vsyncpa [#allocation6 + $0x1], 1 }
  0xe7   :  { %472 = vsyncpa [#allocation4], 1 }
  0xe8   :  { %474 = vsyncpa [#allocation4 + $0x1], 1 }

</bundles_post_ra>
